<compile_context>
chip_gen: v5e
topology: v5e:2x2
jax: 0.10.0
libtpu: 0.0.40
codegen_flags: <defaults>
</compile_context>

<pallas_src>
import jax
import jax.numpy as jnp
from jax.experimental import pallas as pl
from jax.experimental.pallas import tpu as pltpu


def _discriminator_kernel(x_ref, w1_ref, b1_ref, w2_ref, b2_ref, o_ref):
    # Layer 1 on the MXU: (TB, D) bf16 @ (D, 128) bf16, f32 accumulation.
    h = jnp.dot(x_ref[...], w1_ref[...], preferred_element_type=jnp.float32)
    h = h + b1_ref[...]                           # (TB, H) + (1, H)
    # LeakyReLU(0.2) on the VPU (f32 epilogue).
    h = jnp.where(h >= 0, h, 0.2 * h)
    # Layer 2 (out_features == 1): (1, H) @ (H, TB) -> lane-dense (1, TB) row.
    z = jnp.dot(w2_ref[...], h.T, preferred_element_type=jnp.float32)
    z = z + b2_ref[0, 0]                          # scalar bias from SMEM
    # Sigmoid: exp and the approximate reciprocal both go to the EUP.
    o_ref[...] = pl.reciprocal(1.0 + jnp.exp(-z), approx=True).astype(o_ref.dtype)


def discriminator_forward(x, w1, b1, w2, b2, *, block_b=128):
    """Discriminator forward.

    x : (B, img_dim) f32
    w1: (img_dim, 128) f32   (stored (in, out), i.e. PyTorch weight.T)
    b1: (1, 128) f32
    w2: (128, 1) f32
    b2: (1, 1) f32
    returns (B, 1) f32
    """
    B, D = x.shape
    H = w1.shape[1]
    assert w1.shape == (D, H)
    assert block_b % 128 == 0

    # Pad feature dim to a multiple of 128 (lane alignment) and batch to a
    # multiple of the batch tile. Zero padding does not change the result.
    d_pad = ((D + 127) // 128) * 128
    b_pad = ((B + block_b - 1) // block_b) * block_b
    if d_pad != D:
        x = jnp.pad(x, ((0, 0), (0, d_pad - D)))
        w1 = jnp.pad(w1, ((0, d_pad - D), (0, 0)))
    if b_pad != B:
        x = jnp.pad(x, ((0, b_pad - B), (0, 0)))

    # bf16 matmul inputs halve HBM traffic; accumulate in f32 on the MXU.
    x_bf = x.astype(jnp.bfloat16)
    w1_bf = w1.astype(jnp.bfloat16)
    b1_row = jnp.reshape(b1, (1, H)).astype(jnp.float32)
    w2_row = jnp.reshape(w2, (1, H)).astype(jnp.float32)   # lane-dense row
    b2_s = jnp.reshape(b2, (1, 1)).astype(jnp.float32)

    grid = (b_pad // block_b,)
    out_row = pl.pallas_call(
        _discriminator_kernel,
        out_shape=jax.ShapeDtypeStruct((1, b_pad), jnp.float32),
        grid=grid,
        in_specs=[
            pl.BlockSpec((block_b, d_pad), lambda i: (i, 0)),   # x: tiled batch
            pl.BlockSpec((d_pad, H), lambda i: (0, 0)),         # W1: resident
            pl.BlockSpec((1, H), lambda i: (0, 0)),             # b1: resident
            pl.BlockSpec((1, H), lambda i: (0, 0)),             # w2 row: resident
            pl.BlockSpec((1, 1), lambda i: (0, 0),
                         memory_space=pltpu.MemorySpace.SMEM),  # b2 scalar
        ],
        out_specs=pl.BlockSpec((1, block_b), lambda i: (0, i)), # lane-dense out
        compiler_params=pltpu.CompilerParams(
            dimension_semantics=("parallel",),   # shard batch tiles across TCs
            vmem_limit_bytes=32 * 1024 * 1024,
        ),
    )(x_bf, w1_bf, b1_row, w2_row, b2_s)

    # (1, B_pad) lane-dense slab -> (B, 1) column expected by the caller.
    return out_row.reshape(b_pad, 1)[:B]


def _init_linear(key, fan_in, fan_out):
    # PyTorch nn.Linear default init: U(-1/sqrt(fan_in), 1/sqrt(fan_in))
    kw, kb = jax.random.split(key)
    bound = 1.0 / jnp.sqrt(fan_in)
    w = jax.random.uniform(kw, (fan_in, fan_out), jnp.float32, -bound, bound)
    b = jax.random.uniform(kb, (1, fan_out), jnp.float32, -bound, bound)
    return w, b


def _reference(x, w1, b1, w2, b2):
    h = x @ w1 + b1
    h = jnp.where(h >= 0, h, 0.2 * h)
    z = h @ w2 + b2
    return jax.nn.sigmoid(z)


if __name__ == "__main__":
    key = jax.random.PRNGKey(0)
    k_x, k_l1, k_l2 = jax.random.split(key, 3)

    batch = 256
    img_dim = 784    # MNIST 28*28, as in the original GAN script
    hidden = 128

    x = jax.random.normal(k_x, (batch, img_dim), jnp.float32)
    w1, b1 = _init_linear(k_l1, img_dim, hidden)
    w2, b2 = _init_linear(k_l2, hidden, 1)

    out = discriminator_forward(x, w1, b1, w2, b2)
    out = jax.block_until_ready(out)

    ref = _reference(x, w1, b1, w2, b2)
    assert out.shape == (batch, 1)
    # bf16 matmul inputs + approximate EUP reciprocal -> loosened tolerance vs f32 ref.
    max_err = float(jnp.max(jnp.abs(out - ref)))
    assert jnp.allclose(out, ref, atol=2e-2, rtol=2e-2), max_err

    print("KERNEL_OK")
</pallas_src>

<mosaic_0001>
module attributes {stable_mosaic.version = 11 : i64} {
  func.func @_discriminator_kernel(%arg0: i32, %arg1: memref<128x896xbf16, #tpu.memory_space<vmem>>, %arg2: memref<896x128xbf16, #tpu.memory_space<vmem>>, %arg3: memref<1x128xf32, #tpu.memory_space<vmem>>, %arg4: memref<1x128xf32, #tpu.memory_space<vmem>>, %arg5: memref<1x1xf32, #tpu.memory_space<smem>>, %arg6: memref<1x128xf32, #tpu.memory_space<vmem>>) attributes {dimension_semantics = [#tpu.dimension_semantics<parallel>], iteration_bounds = array<i64: 2>, scalar_prefetch = 0 : i64, scratch_operands = 0 : i64, tpu.core_type = #tpu.core_type<tc>, window_params = [{transform_indices = @transform_0, window_bounds = array<i64: 128, 896>}, {pipeline_mode = #tpu.pipeline_mode<synchronous>, transform_indices = @transform_1, window_bounds = array<i64: 896, 128>}, {pipeline_mode = #tpu.pipeline_mode<synchronous>, transform_indices = @transform_2, window_bounds = array<i64: 1, 128>}, {pipeline_mode = #tpu.pipeline_mode<synchronous>, transform_indices = @transform_3, window_bounds = array<i64: 1, 128>}, {transform_indices = @transform_4, window_bounds = array<i64: 1, 1>}, {transform_indices = @transform_5, window_bounds = array<i64: 1, 128>}]} {
    %c0 = arith.constant 0 : index
    %c0_0 = arith.constant 0 : index
    %0 = vector.load %arg1[%c0, %c0_0] : memref<128x896xbf16, #tpu.memory_space<vmem>>, vector<128x896xbf16>
    %c0_1 = arith.constant 0 : index
    %c0_2 = arith.constant 0 : index
    %1 = vector.load %arg2[%c0_1, %c0_2] : memref<896x128xbf16, #tpu.memory_space<vmem>>, vector<896x128xbf16>
    %cst = arith.constant dense<0.000000e+00> : vector<128x128xf32>
    %2 = tpu.matmul %0, %1, %cst {dimension_numbers = #tpu.dot_dimension_numbers<[1], [0], [0], [1], [0, 0, 1, 1], [], []>} : vector<128x896xbf16>, vector<896x128xbf16>, vector<128x128xf32> -> vector<128x128xf32>
    %c0_3 = arith.constant 0 : index
    %c0_4 = arith.constant 0 : index
    %3 = vector.load %arg3[%c0_3, %c0_4] : memref<1x128xf32, #tpu.memory_space<vmem>>, vector<1x128xf32>
    %4 = vector.broadcast %3 : vector<1x128xf32> to vector<128x128xf32>
    %5 = arith.addf %2, %4 : vector<128x128xf32>
    %cst_5 = arith.constant 0.000000e+00 : f32
    %6 = vector.broadcast %cst_5 : f32 to vector<128x128xf32>
    %7 = arith.cmpf oge, %5, %6 : vector<128x128xf32>
    %cst_6 = arith.constant 2.000000e-01 : f32
    %8 = vector.broadcast %cst_6 : f32 to vector<128x128xf32>
    %9 = arith.mulf %8, %5 : vector<128x128xf32>
    %10 = arith.select %7, %5, %9 : vector<128x128xi1>, vector<128x128xf32>
    %c0_7 = arith.constant 0 : index
    %c0_8 = arith.constant 0 : index
    %11 = vector.load %arg4[%c0_7, %c0_8] : memref<1x128xf32, #tpu.memory_space<vmem>>, vector<1x128xf32>
    %12 = tpu.transpose %10, [1, 0] : vector<128x128xf32> -> vector<128x128xf32>
    %cst_9 = arith.constant dense<0.000000e+00> : vector<1x128xf32>
    %13 = tpu.matmul %11, %12, %cst_9 {dimension_numbers = #tpu.dot_dimension_numbers<[1], [0], [0], [1], [0, 0, 1, 1], [], []>} : vector<1x128xf32>, vector<128x128xf32>, vector<1x128xf32> -> vector<1x128xf32>
    %c0_10 = arith.constant 0 : index
    %c0_11 = arith.constant 0 : index
    %14 = memref.load %arg5[%c0_10, %c0_11] : memref<1x1xf32, #tpu.memory_space<smem>>
    %15 = vector.broadcast %14 : f32 to vector<1x128xf32>
    %16 = arith.addf %13, %15 : vector<1x128xf32>
    %cst_12 = arith.constant 0.000000e+00 : f32
    %17 = vector.broadcast %cst_12 : f32 to vector<1x128xf32>
    %18 = arith.subf %17, %16 : vector<1x128xf32>
    %19 = math.exp %18 : vector<1x128xf32>
    %cst_13 = arith.constant 1.000000e+00 : f32
    %20 = vector.broadcast %cst_13 : f32 to vector<1x128xf32>
    %21 = arith.addf %20, %19 : vector<1x128xf32>
    %22 = tpu.reciprocal %21 {approx = true} : vector<1x128xf32> -> vector<1x128xf32>
    %c0_14 = arith.constant 0 : index
    %c0_15 = arith.constant 0 : index
    %23 = vector.load %arg6[%c0_14, %c0_15] : memref<1x128xf32, #tpu.memory_space<vmem>>, vector<1x128xf32>
    tpu.vector_store %arg6[%c0_14, %c0_15], %22 {strides = array<i32>} : memref<1x128xf32, #tpu.memory_space<vmem>>, vector<1x128xf32>,
    return
  }
  func.func @transform_0(%arg0: i32) -> (i32, i32) {
    %c0_i32 = arith.constant 0 : i32
    %c0_i32_0 = arith.constant 0 : i32
    return %arg0, %c0_i32 : i32, i32
  }
  func.func @transform_1(%arg0: i32) -> (i32, i32) {
    %c0_i32 = arith.constant 0 : i32
    %c0_i32_0 = arith.constant 0 : i32
    %c0_i32_1 = arith.constant 0 : i32
    return %c0_i32, %c0_i32_0 : i32, i32
  }
  func.func @transform_2(%arg0: i32) -> (i32, i32) {
    %c0_i32 = arith.constant 0 : i32
    %c0_i32_0 = arith.constant 0 : i32
    %c0_i32_1 = arith.constant 0 : i32
    return %c0_i32, %c0_i32_0 : i32, i32
  }
  func.func @transform_3(%arg0: i32) -> (i32, i32) {
    %c0_i32 = arith.constant 0 : i32
    %c0_i32_0 = arith.constant 0 : i32
    %c0_i32_1 = arith.constant 0 : i32
    return %c0_i32, %c0_i32_0 : i32, i32
  }
  func.func @transform_4(%arg0: i32) -> (i32, i32) {
    %c0_i32 = arith.constant 0 : i32
    %c0_i32_0 = arith.constant 0 : i32
    %c0_i32_1 = arith.constant 0 : i32
    return %c0_i32, %c0_i32_0 : i32, i32
  }
  func.func @transform_5(%arg0: i32) -> (i32, i32) {
    %c0_i32 = arith.constant 0 : i32
    %c0_i32_0 = arith.constant 0 : i32
    return %c0_i32, %arg0 : i32, i32
  }
}

</mosaic_0001>

<bundles_post_ra>
// kernel: tpu_custom_call.1
= control target key start
LH: loop header
LB: loop body
LE: loop exit
PB: predicated region body
PF: predicated region fallthrough
CT: control target
= control target key end

     0   :  { %s2804_s0 = inlined_call_operand.hbm [shape: bf16[256,896], index: 0, kind: input, shape index: {}]   ;;  %s2805_s1 = inlined_call_operand.hbm [shape: bf16[896,128], index: 1, kind: input, shape index: {}]   ;;  %s2806_s2 = inlined_call_operand.vmem [shape: f32[1,128], index: 2, kind: input, shape index: {}]   ;;  %s2807_s3 = inlined_call_operand.vmem [shape: f32[1,128], index: 3, kind: input, shape index: {}]   ;;  %s2808_s4 = inlined_call_operand.<no memory space> [shape: f32[1,1], index: 4, kind: input, shape index: {}]   ;;  %s2809_s5 = inlined_call_operand.hbm [shape: f32[1,256], index: 5, kind: output, shape index: {}]  }
   0x1   :  { %10 = sst [smem:[#allocation2]] %s2808_s4 }
   0x2   :  { %11 = vsyncpa [#allocation4], 0 }
   0x3   :  { %13 = vsyncpa [#allocation4 + $0x1], 0 }
   0x4   :  { %14 = vsyncpa [#allocation7], 0 }
   0x5   :  { %15 = vsyncpa [#allocation5], 0 }
   0x6   :  { %17 = vsyncpa [#allocation5 + $0x1], 0  ;;  %s2411_s20 = smov 0   ;;  %s2413_s21 = smov 0  }
   0x7   :  { %s2415_s22 = smov 0   ;;  %s2417_s23 = smov 0  }
   0x8 LB: > { %s2432_s4 = sadd.s32 4294967295, %s2371_s23   ;;  %s1577_s24 = sadd.s32 4294967294, %s2371_s23   ;;  %s2371_s23 = sphi %s2417_s23, %s2819_s23   ;;  %s2367_s22 = sphi %s2415_s22, %s2818_s22   ;;  %s2363_s21 = sphi %s2413_s21, %s2817_s21   ;;  %s2359_s20 = sphi %s2411_s20, %s2816_s20  }
   0x9   : > { %p43_p0 = scmp.ne.s32.totalorder %s2363_s21, %s2359_s20  ;;  %p44_p1 = scmp.eq.s32.totalorder %s2432_s4, 0 }
   0xa   : > { %p151_p2 = scmp.eq.s32.totalorder %s2432_s4, 1  ;;  %p157_p3 = scmp.eq.s32.totalorder %s1577_s24, 1 }
   0xb   : > { %p2441_p4 = por %p44_p1, %p43_p0  ;;  %p1578_p5 = scmp.ge.s32.totalorder %s2371_s23, 1 }
   0xc   : > { %p2446_p6 = por %p157_p3, %p43_p0  ;;  %p164_p7 = scmp.lt.s32.totalorder %s2371_s23, 3 }
   0xd   : > { %s175_s29 = sshll.u32 %s2805_s1, 4  ;;  %s2373_s6 = smov [#allocation6]   ;;  %s176_s29 = int_to_ptr.hbm [resolvable:$true] %s175_s29 }
   0xe   : > { %p2454_p8 = pnand %p1578_p5, %p164_p7  ;;  %s177_s7 = sshll.u32 %s2373_s6, 4  ;;  %s178_s7 = int_to_ptr.vmem [resolvable:$true] %s177_s7 }
   0xf   : > { %s2464_s8 = sadd.s32 1, %s2371_s23   ;;  %s2374_s9 = smov 64  }
  0x10   : > { %p2183_p9 = pneg %p2454_p8  ;;  %s2375_s10 = smov 4  }
  0x11   : > { %s27_s11 = ssub.s32 %s2371_s23, %s2464_s8  ;;  %s30_s12 = sadd.s32 1, %s2367_s22 }
  0x12   : > { %p2184_p10 = pnand %p2183_p9, %p44_p1  ;;  %p28_p12 = scmp.eq.s32.totalorder %s27_s11, 0 }
  0x13   : > { %p37_p13 = scmp.ne.s32.totalorder %s2367_s22, %s2363_s21  ;;  %p38_p0 = scmp.eq.s32.totalorder %s2371_s23, 0 }
  0x14   : > { %2186 = dma.hbm_to_vmem [thread:$0]  (!%p2184_p10), %s176_s29, 7168, %s178_s7, [#allocation7], %s2374_s9, %s2374_s9, %s2375_s10  }
  0x15   : > { %p2196_p3 = scmp.lt.s32.totalorder %s2371_s23, 2  ;;  %p39_p5 = por %p38_p0, %p37_p13 }
  0x16   : > { %s2474_s13 = scalar_select %p28_p12, %s2367_s22, %s30_s12  }
  0x17   : > { %p2478_p7 = por %p151_p2, %p37_p13  ;;  %s200_s15 = sand.u32 1, %s2367_s22  }
  0x18   : > { %s2173_s16 = smul.u32 448, %s2371_s23  ;;  %p2487_p9 = pnand %p2196_p3, %p39_p5 }
  0x19   : > { %s2172_s17 = smul.u32 448, %s200_s15  ;;  %s201_s7 = scalar_lea.sflag [#allocation4], %s200_s15 }
  0x1a   : > { %s210_s24 = scalar_lea.hbm %s2804_s0, %s2173_s16  ;;  %p2275_p10 = pneg %p2487_p9 }
  0x1b   : > { %s211_s28 = sshll.u32 %s210_s24, 4  ;;  %s204_s29 = scalar_lea.vmem [#allocation3], %s2172_s17  ;;  %s212_s28 = int_to_ptr.hbm [resolvable:$true] %s211_s28 }
  0x1c   : > { %s213_s6 = sshll.u32 %s204_s29, 4  ;;  %s2271_s9 = sshra.s32 %s212_s28, 4  ;;  %s214_s6 = int_to_ptr.vmem [resolvable:$true] %s213_s6  ;;  %s2272_s9 = int_to_ptr.hbm [resolvable:$true] %s2271_s9 }
  0x1d   : > { %s2273_s10 = scalar_lea.hbm %s2272_s9, 448  ;;  %s2278_s16 = scalar_lea.hbm %s2804_s0, 896 }
  0x1e   : > { %p2274_p2 = scmp.ne.s32.totalorder %s2272_s9, %s2273_s10  ;;  %p2279_p0 = scmp.lt.s32.totalorder %s2272_s9, %s2804_s0 }
  0x1f   : > { %p2280_p3 = scmp.lt.s32.totalorder %s2278_s16, %s2273_s10 }
  0x20   : > { %p2276_p12 = pnand %p2275_p10, %p2274_p2 }
  0x21   : > { %p2281_p5 = por %p2280_p3, %p2279_p0 }
  0x22   : > { %p2277_p13 = pneg %p2276_p12 }
  0x24   : > { %p2282_p11 = pnand %p2281_p5, %p2277_p13 }
  0x26   : > { %2285 = shalt.err (!%p2282_p11)
}
  0x27   : > { %s2376_s15 = smov 448   ;;  %s2377_s17 = smov 28  }
  0x28   : > { %2190 = dma.hbm_to_vmem [thread:$0]  (!%p2487_p9), %s212_s28, 7168, %s214_s6, %s201_s7, %s2376_s15, %s2376_s15, %s2377_s17  }
  0x29   : > { %225 = sbr.rel (%p2454_p8) target bundleno = 672 (0x2a0), region = 40  ;;  %s2504_s24 = sand.u32 (!%p2454_p8), 1, %s2363_s21  }
  0x2a   : > { %s2174_s29 = smul.u32 (!%p2454_p8), 448, %s2504_s24  ;;  %s228_s9 = scalar_lea.sflag (!%p2454_p8), [#allocation4], %s2504_s24 }
  0x2c   : > { %s2508_s10 = scalar_lea.vmem (!%p2454_p8), [#allocation3], %s2174_s29 }
  0x2e   : > { %2346 = dma.done.wait (%p2441_p4), %s228_s9, 7168  }
  0x2f   : > { %2348 = vsyncadd (%p2441_p4), %s228_s9, 4294960128 }
  0x30   : > { %2350 = dma.done.wait (%p44_p1), [#allocation7], 7168  }
  0x31   : > { %2352 = vsyncadd (%p44_p1), [#allocation7], 4294960128  ;;  %v2099_v0 = vld [vmem:[#allocation6 + $0x38] sm:$0xff]  ;;  %v2098_v3 = vld [vmem:[#allocation6 + $0x30] sm:$0xff]  ;;  %s1460_s6 = sld [smem:[#allocation2]]  ;;  %s1497_s12 = scalar_lea.hbm %s2809_s5, %s2432_s4 }
  0x32   : > { %v2107_v1 = vld [vmem:[#allocation6 + $0x78] sm:$0xff]  ;;  %1068 = vmatpush.bf16.msra.mxu0 %v2099_v0  ;;  %2148 = vmatpush.bf16.msra.mxu3 %v2099_v0  ;;  %v2106_v4 = vld [vmem:[#allocation6 + $0x70] sm:$0xff]  ;;  %v2097_v6 = vld [vmem:[#allocation6 + $0x28] sm:$0xff]  ;;  %s262_s16 = scalar_lea.vmem [#allocation8], %s2504_s24  ;;  %s1501_s19 = sshll.u32 %s1497_s12, 4  ;;  %s1502_s19 = int_to_ptr.hbm [resolvable:$true] %s1501_s19 }
  0x33   : > { %v2115_v2 = vld [vmem:[#allocation6 + $0xb8] sm:$0xff]  ;;  %1117 = vmatpush.bf16.msra.mxu1 %v2107_v1  ;;  %v2114_v5 = vld [vmem:[#allocation6 + $0xb0] sm:$0xff]  ;;  %v2105_v7 = vld [vmem:[#allocation6 + $0x68] sm:$0xff]  ;;  %s1499_s18 = sshll.u32 %s262_s16, 4  ;;  %s1489_s15 = scalar_lea.sflag [#allocation5], %s2504_s24  ;;  %s1500_s18 = int_to_ptr.vmem [resolvable:$true] %s1499_s18 }
  0x34   : > { %1166 = vmatpush.bf16.msra.mxu2 %v2115_v2  ;;  %v2113_v8 = vld [vmem:[#allocation6 + $0xa8] sm:$0xff]  ;;  %v2096_v9 = vld [vmem:[#allocation6 + $0x20] sm:$0xff]  ;;  %v2095_v12 = vld [vmem:[#allocation6 + $0x18] sm:$0xff]  ;;  %s2315_s17 = sshra.s32 %s1502_s19, 4  ;;  %s2321_s4 = scalar_lea.hbm %s2809_s5, 2  ;;  %s2316_s17 = int_to_ptr.hbm [resolvable:$true] %s2315_s17 }
  0x35   : > { %v2104_v10 = vld [vmem:[#allocation6 + $0x60] sm:$0xff]  ;;  %v2103_v13 = vld [vmem:[#allocation6 + $0x58] sm:$0xff]  ;;  %v2094_v15 = vld [vmem:[#allocation6 + $0x10] sm:$0xff]  ;;  %s2317_s29 = scalar_lea.hbm %s2316_s17, 1  ;;  %p2322_p11 = scmp.lt.s32.totalorder %s2316_s17, %s2809_s5 }
  0x36   : > { %1069 = vmatpush.bf16.msra.mxu0 %v2098_v3  ;;  %2149 = vmatpush.bf16.msra.mxu3 %v2098_v3  ;;  %v2112_v11 = vld [vmem:[#allocation6 + $0xa0] sm:$0xff]  ;;  %v2111_v14 = vld [vmem:[#allocation6 + $0x98] sm:$0xff]  ;;  %v2102_v16 = vld [vmem:[#allocation6 + $0x50] sm:$0xff]  ;;  %p2318_p1 = scmp.ne.s32.totalorder %s2316_s17, %s2317_s29  ;;  %p2323_p9 = scmp.lt.s32.totalorder %s2321_s4, %s2317_s29 }
  0x37   : > { %1118 = vmatpush.bf16.msra.mxu1 %v2106_v4  ;;  %v2110_v17 = vld [vmem:[#allocation6 + $0x90] sm:$0xff]  ;;  %v2093_v18 = vld [vmem:[#allocation6 + $0x8] sm:$0xff]  ;;  %v2092_v21 = vld [vmem:[#allocation6] sm:$0xff] }
  0x38   : > { %1167 = vmatpush.bf16.msra.mxu2 %v2114_v5  ;;  %v2101_v19 = vld [vmem:[#allocation6 + $0x48] sm:$0xff]  ;;  %v2100_v22 = vld [vmem:[#allocation6 + $0x40] sm:$0xff]  ;;  %v2039_v25 = vld [vmem:[%s2508_s10 + $0x18] sm:$0xf0]  ;;  %p2319_p4 = pnand %p2318_p1, %p2478_p7  ;;  %p2324_p2 = por %p2323_p9, %p2322_p11 }
  0x39   : > { %v2109_v20 = vld [vmem:[#allocation6 + $0x88] sm:$0xff]  ;;  %v2108_v23 = vld [vmem:[#allocation6 + $0x80] sm:$0xff]  ;;  %v1644_v26 = vld [vmem:[%s2508_s10 + $0x70] sm:$0xf] }
  0x3a   : > { %1070 = vmatpush.bf16.msra.mxu0 %v2097_v6  ;;  %2150 = vmatpush.bf16.msra.mxu3 %v2097_v6  ;;  %v1588_v24 = vld [vmem:[%s2508_s10] sm:$0xf]  ;;  %v2053_v27 = vld [vmem:[%s2508_s10 + $0x88] sm:$0xf0]  ;;  %v2036_v28 = vld [vmem:[%s2508_s10 + $0x4] sm:$0xf]  ;;  %p2320_p8 = pneg %p2319_p4 }
  0x3b   : > { %1119 = vmatpush.bf16.msra.mxu1 %v2105_v7  ;;  %v1590_v29 = vld [vmem:[%s2508_s10 + $0x1c] sm:$0xf0]  ;;  %v1596_v30 = vld [vmem:[%s2508_s10 + $0x8] sm:$0xf]  ;;  %v2040_v31 = vld [vmem:[%s2508_s10 + $0x20] sm:$0xf0]  ;;  %v1589_v33 = vor.u32 %v2039_v25, %v1588_v24  ;;  %v1645_v34 = vor.u32 %v2053_v27, %v1644_v26 }
  0x3c   : > { %1168 = vmatpush.bf16.msra.mxu2 %v2113_v8  ;;  %v2131_v32 = vld [vmem:[#allocation6 + $0x138] sm:$0xff]  ;;  %v1593_v35 = vor.u32 %v2036_v28, %v1590_v29  ;;  %v1597_v36 = vor.u32 %v2040_v31, %v1596_v30  ;;  %v2130_v37 = vld [vmem:[#allocation6 + $0x130] sm:$0xff]  ;;  %v2129_v38 = vld [vmem:[#allocation6 + $0x128] sm:$0xff]  ;;  %p2325_p10 = pnand %p2324_p2, %p2320_p8 }
  0x3d   : > { %v2128_v39 = vld [vmem:[#allocation6 + $0x120] sm:$0xff]  ;;  %v1616_v40 = vld [vmem:[%s2508_s10 + $0x38] sm:$0xf]  ;;  %v2046_v41 = vld [vmem:[%s2508_s10 + $0x50] sm:$0xf0] }
  0x3e   : > { %1071 = vmatpush.bf16.msra.mxu0 %v2096_v9  ;;  %2151 = vmatpush.bf16.msra.mxu3 %v2096_v9  ;;  %v1672_v42 = vld [vmem:[%s2508_s10 + $0xa8] sm:$0xf]  ;;  %v2060_v43 = vld [vmem:[%s2508_s10 + $0xc0] sm:$0xf0]  ;;  %v2043_v44 = vld [vmem:[%s2508_s10 + $0x3c] sm:$0xf]  ;;  %v1617_v49 = vor.u32 %v2046_v41, %v1616_v40 }
  0x3f   : > { %1120 = vmatpush.bf16.msra.mxu1 %v2104_v10  ;;  %v1618_v45 = vld [vmem:[%s2508_s10 + $0x54] sm:$0xf0]  ;;  %v1624_v46 = vld [vmem:[%s2508_s10 + $0x40] sm:$0xf]  ;;  %v2047_v47 = vld [vmem:[%s2508_s10 + $0x58] sm:$0xf0]  ;;  %v1673_v50 = vor.u32 %v2060_v43, %v1672_v42 }
  0x40   : > { %1169 = vmatpush.bf16.msra.mxu2 %v2112_v11  ;;  %v2127_v48 = vld [vmem:[#allocation6 + $0x118] sm:$0xff]  ;;  %v1621_v51 = vor.u32 %v2043_v44, %v1618_v45  ;;  %v1625_v52 = vor.u32 %v2047_v47, %v1624_v46  ;;  %v2126_v53 = vld [vmem:[#allocation6 + $0x110] sm:$0xff]  ;;  %v2125_v54 = vld [vmem:[#allocation6 + $0x108] sm:$0xff] }
  0x41   : > { %v2124_v55 = vld [vmem:[#allocation6 + $0x100] sm:$0xff]  ;;  %v2067_v57 = vld [vmem:[%s2508_s10 + $0xf8] sm:$0xf0]  ;;  %v2050_v58 = vld [vmem:[%s2508_s10 + $0x74] sm:$0xf] }
  0x42   : > { %1072 = vmatpush.bf16.msra.mxu0 %v2095_v12  ;;  %2152 = vmatpush.bf16.msra.mxu3 %v2095_v12  ;;  %v1700_v56 = vld [vmem:[%s2508_s10 + $0xe0] sm:$0xf]  ;;  %v1604_v59 = vld [vmem:[%s2508_s10 + $0x10] sm:$0xf]  ;;  %v2041_v60 = vld [vmem:[%s2508_s10 + $0x28] sm:$0xf0] }
  0x43   : > { %1121 = vmatpush.bf16.msra.mxu1 %v2103_v13  ;;  %v1646_v61 = vld [vmem:[%s2508_s10 + $0x8c] sm:$0xf0]  ;;  %v1652_v62 = vld [vmem:[%s2508_s10 + $0x78] sm:$0xf]  ;;  %v2054_v63 = vld [vmem:[%s2508_s10 + $0x90] sm:$0xf0]  ;;  %v1701_v0 = vor.u32 %v2067_v57, %v1700_v56  ;;  %v1605_v1 = vor.u32 %v2041_v60, %v1604_v59 }
  0x44   : > { %1170 = vmatpush.bf16.msra.mxu2 %v2111_v14  ;;  %v1649_v2 = vor.u32 %v2050_v58, %v1646_v61  ;;  %v1653_v3 = vor.u32 %v2054_v63, %v1652_v62  ;;  %v2123_v4 = vld [vmem:[#allocation6 + $0xf8] sm:$0xff]  ;;  %v2122_v7 = vld [vmem:[#allocation6 + $0xf0] sm:$0xff]  ;;  %v2121_v8 = vld [vmem:[#allocation6 + $0xe8] sm:$0xff] }
  0x45   : > { %v2542_v5 = vld [vmem:[#allocation6 + $0x1b8] sm:$0xff]  ;;  %v2074_v10 = vld [vmem:[%s2508_s10 + $0x130] sm:$0xf0]  ;;  %v2057_v11 = vld [vmem:[%s2508_s10 + $0xac] sm:$0xf] }
  0x46   : > { %1073 = vmatpush.bf16.msra.mxu0 %v2094_v15  ;;  %2153 = vmatpush.bf16.msra.mxu3 %v2094_v15  ;;  %v2139_v6 = vld [vmem:[#allocation6 + $0x178] sm:$0xff]  ;;  %v1674_v12 = vld [vmem:[%s2508_s10 + $0xc4] sm:$0xf0]  ;;  %v2048_v14 = vld [vmem:[%s2508_s10 + $0x60] sm:$0xf0] }
  0x47   : > { %1122 = vmatpush.bf16.msra.mxu1 %v2102_v16  ;;  %v1728_v9 = vld [vmem:[%s2508_s10 + $0x118] sm:$0xf]  ;;  %v1632_v13 = vld [vmem:[%s2508_s10 + $0x48] sm:$0xf]  ;;  %v1680_v15 = vld [vmem:[%s2508_s10 + $0xb0] sm:$0xf] }
  0x48   : > { %1171 = vmatpush.bf16.msra.mxu2 %v2110_v17  ;;  %v2061_v16 = vld [vmem:[%s2508_s10 + $0xc8] sm:$0xf0]  ;;  %v2120_v17 = vld [vmem:[#allocation6 + $0xe0] sm:$0xff]  ;;  %v2138_v24 = vld [vmem:[#allocation6 + $0x170] sm:$0xff] }
  0x49   : > { %v2118_v25 = vld [vmem:[#allocation6 + $0xd0] sm:$0xff]  ;;  %v2117_v26 = vld [vmem:[#allocation6 + $0xc8] sm:$0xff]  ;;  %v2064_v29 = vld [vmem:[%s2508_s10 + $0xe4] sm:$0xf] }
  0x4a   : > { %1074 = vmatpush.bf16.msra.mxu0 %v2093_v18  ;;  %2154 = vmatpush.bf16.msra.mxu3 %v2093_v18  ;;  %v1729_v18 = vor.u32 %v2074_v10, %v1728_v9  ;;  %v1756_v27 = vld [vmem:[%s2508_s10 + $0x150] sm:$0xf]  ;;  %v2081_v28 = vld [vmem:[%s2508_s10 + $0x168] sm:$0xf0]  ;;  %v1702_v30 = vld [vmem:[%s2508_s10 + $0xfc] sm:$0xf0] }
  0x4b   : > { %1123 = vmatpush.bf16.msra.mxu1 %v2101_v19  ;;  %v1633_v19 = vor.u32 %v2048_v14, %v1632_v13  ;;  %v1660_v31 = vld [vmem:[%s2508_s10 + $0x80] sm:$0xf]  ;;  %v2564_v40 = vld [vmem:[#allocation6 + $0x1a8] sm:$0xff]  ;;  %v2088_v45 = vld [vmem:[%s2508_s10 + $0x1a0] sm:$0xf0] }
  0x4c   : > { %1172 = vmatpush.bf16.msra.mxu2 %v2109_v20  ;;  %v1677_v20 = vor.u32 %v2057_v11, %v1674_v12  ;;  %v2137_v41 = vld [vmem:[#allocation6 + $0x168] sm:$0xff]  ;;  %v2136_v42 = vld [vmem:[#allocation6 + $0x160] sm:$0xff]  ;;  %v2071_v46 = vld [vmem:[%s2508_s10 + $0x11c] sm:$0xf] }
  0x4d   : > { %v2567_v43 = vld [vmem:[#allocation6 + $0x1a0] sm:$0xff]  ;;  %v1784_v44 = vld [vmem:[%s2508_s10 + $0x188] sm:$0xf]  ;;  %v1688_v47 = vld [vmem:[%s2508_s10 + $0xb8] sm:$0xf] }
  0x4e   : > { %1075 = vmatpush.bf16.msra.mxu0 %v2092_v21  ;;  %2155 = vmatpush.bf16.msra.mxu3 %v2092_v21  ;;  %v1681_v21 = vor.u32 %v2061_v16, %v1680_v15  ;;  %v2135_v56 = vld [vmem:[#allocation6 + $0x158] sm:$0xff]  ;;  %v2134_v58 = vld [vmem:[#allocation6 + $0x150] sm:$0xff]  ;;  %v2133_v60 = vld [vmem:[#allocation6 + $0x148] sm:$0xff] }
  0x4f   : > { %1124 = vmatpush.bf16.msra.mxu1 %v2100_v22  ;;  %v2119_v22 = vld [vmem:[#allocation6 + $0xd8] sm:$0xff]  ;;  %v2142_v59 = vld [vmem:[#allocation6 + $0x190] sm:$0xff]  ;;  %v2141_v61 = vld [vmem:[#allocation6 + $0x188] sm:$0xff] }
  0x50   : > { %1173 = vmatpush.bf16.msra.mxu2 %v2108_v23  ;;  %v2553_v23 = vld [vmem:[#allocation6 + $0x1b0] sm:$0xff]  ;;  %v2143_v57 = vld [vmem:[#allocation6 + $0x198] sm:$0xff]  ;;  %v2037_v63 = vld [vmem:[%s2508_s10 + $0xc] sm:$0xf] }
  0x51   : > { %1076 = vmatmul.bf16.vlgmr.msra.gmra.mxu0 %v1589_v33  ;;  %1086 = vmatmul.bf16.vlgmr.msra.gmra.mxu3 %v1645_v34  ;;  %v1708_v33 = vld [vmem:[%s2508_s10 + $0xe8] sm:$0xf]  ;;  %v2068_v34 = vld [vmem:[%s2508_s10 + $0x100] sm:$0xf0]  ;;  %v2078_v62 = vld [vmem:[%s2508_s10 + $0x154] sm:$0xf] }
  0x52   : > { %1264 = vmatpush.bf16.msrb.mxu0 %v2131_v32  ;;  %1125 = vmatmul.bf16.vlgmr.msra.gmra.mxu1 %v1593_v35  ;;  %v2055_v32 = vld [vmem:[%s2508_s10 + $0x98] sm:$0xf0]  ;;  %v2116_v35 = vld [vmem:[#allocation6 + $0xc0] sm:$0xff]  ;;  %v2085_v13 = vld [vmem:[%s2508_s10 + $0x18c] sm:$0xf] }
  0x53   : > { %1174 = vmatmul.bf16.vlgmr.msra.gmra.mxu2 %v1597_v36  ;;  %1215 = vmatpush.bf16.msrb.mxu3 %v2123_v4  ;;  %v1757_v36 = vor.u32 %v2081_v28, %v1756_v27  ;;  %v1764_v4 = vld [vmem:[%s2508_s10 + $0x158] sm:$0xf]  ;;  %v2132_v9 = vld [vmem:[#allocation6 + $0x140] sm:$0xff]  ;;  %v1744_v16 = vld [vmem:[%s2508_s10 + $0x128] sm:$0xf] }
  0x54   : > { %2164 = vmatpush.bf16.msrb.mxu2 %v2542_v5  ;;  %2156 = vmatpush.bf16.msrb.mxu1 %v2139_v6  ;;  %v2140_v10 = vld [vmem:[#allocation6 + $0x180] sm:$0xff]  ;;  %v2083_v28 = vld [vmem:[%s2508_s10 + $0x178] sm:$0xf0] }
  0x55   : > { %v2044_v14 = vld [vmem:[%s2508_s10 + $0x44] sm:$0xf]  ;;  %v1626_v15 = vld [vmem:[%s2508_s10 + $0x5c] sm:$0xf0] }
  0x56   : > { %1265 = vmatpush.bf16.msrb.mxu0 %v2130_v37  ;;  %v1661_v37 = vor.u32 %v2055_v32, %v1660_v31  ;;  %v1772_v27 = vld [vmem:[%s2508_s10 + $0x160] sm:$0xf]  ;;  %v1640_v31 = vld [vmem:[%s2508_s10 + $0x50] sm:$0xf]  ;;  %v2049_v32 = vld [vmem:[%s2508_s10 + $0x68] sm:$0xf0] }
  0x57   : > { %1216 = vmatpush.bf16.msrb.mxu3 %v2122_v7 }
  0x58   : > { %2165 = vmatpush.bf16.msrb.mxu2 %v2553_v23  ;;  %2157 = vmatpush.bf16.msrb.mxu1 %v2138_v24 }
  0x5a   : > { %1266 = vmatpush.bf16.msrb.mxu0 %v2129_v38  ;;  %v1705_v38 = vor.u32 %v2064_v29, %v1702_v30  ;;  %v2045_v29 = vld [vmem:[%s2508_s10 + $0x4c] sm:$0xf]  ;;  %v1634_v30 = vld [vmem:[%s2508_s10 + $0x64] sm:$0xf0] }
  0x5b   : > { %1217 = vmatpush.bf16.msrb.mxu3 %v2121_v8 }
  0x5c   : > { %2166 = vmatpush.bf16.msrb.mxu2 %v2564_v40  ;;  %2158 = vmatpush.bf16.msrb.mxu1 %v2137_v41 }
  0x5e   : > { %1267 = vmatpush.bf16.msrb.mxu0 %v2128_v39  ;;  %v1709_v39 = vor.u32 %v2068_v34, %v1708_v33  ;;  %v1773_v34 = vor.u32 %v2083_v28, %v1772_v27 }
  0x5f   : > { %1218 = vmatpush.bf16.msrb.mxu3 %v2120_v17  ;;  %v2076_v17 = vld [vmem:[%s2508_s10 + $0x140] sm:$0xf0] }
  0x60   : > { %2159 = vmatpush.bf16.msrb.mxu1 %v2136_v42  ;;  %2167 = vmatpush.bf16.msrb.mxu2 %v2567_v43 }
  0x61   : > { %1081 = vmatmul.bf16.gmra.mxu0 %v1617_v49  ;;  %1091 = vmatmul.bf16.gmra.mxu3 %v1673_v50  ;;  %v1730_v49 = vld [vmem:[%s2508_s10 + $0x134] sm:$0xf0]  ;;  %v1736_v50 = vld [vmem:[%s2508_s10 + $0x120] sm:$0xf] }
  0x62   : > { %1268 = vmatpush.bf16.msrb.mxu0 %v2127_v48  ;;  %1130 = vmatmul.bf16.gmra.mxu1 %v1621_v51  ;;  %v2062_v48 = vld [vmem:[%s2508_s10 + $0xd0] sm:$0xf0]  ;;  %v2075_v51 = vld [vmem:[%s2508_s10 + $0x138] sm:$0xf0] }
  0x63   : > { %1179 = vmatmul.bf16.gmra.mxu2 %v1625_v52  ;;  %1219 = vmatpush.bf16.msrb.mxu3 %v2119_v22  ;;  %v1785_v52 = vor.u32 %v2088_v45, %v1784_v44  ;;  %v1745_v22 = vor.u32 %v2076_v17, %v1744_v16  ;;  %v1690_v16 = vld [vmem:[%s2508_s10 + $0xd4] sm:$0xf0]  ;;  %v1696_v17 = vld [vmem:[%s2508_s10 + $0xc0] sm:$0xf] }
  0x64   : > { %2160 = vmatpush.bf16.msrb.mxu1 %v2135_v56  ;;  %2168 = vmatpush.bf16.msrb.mxu2 %v2143_v57 }
  0x66   : > { %1269 = vmatpush.bf16.msrb.mxu0 %v2126_v53  ;;  %v1689_v53 = vor.u32 %v2062_v48, %v1688_v47  ;;  %v2058_v48 = vld [vmem:[%s2508_s10 + $0xb4] sm:$0xf] }
  0x67   : > { %1220 = vmatpush.bf16.msrb.mxu3 %v2118_v25  ;;  %v2051_v25 = vld [vmem:[%s2508_s10 + $0x7c] sm:$0xf] }
  0x68   : > { %2161 = vmatpush.bf16.msrb.mxu1 %v2134_v58  ;;  %2169 = vmatpush.bf16.msrb.mxu2 %v2142_v59 }
  0x6a   : > { %1270 = vmatpush.bf16.msrb.mxu0 %v2125_v54  ;;  %v1733_v54 = vor.u32 %v2071_v46, %v1730_v49  ;;  %v1682_v49 = vld [vmem:[%s2508_s10 + $0xcc] sm:$0xf0] }
  0x6b   : > { %1221 = vmatpush.bf16.msrb.mxu3 %v2117_v26  ;;  %v1654_v26 = vld [vmem:[%s2508_s10 + $0x94] sm:$0xf0] }
  0x6c   : > { %2162 = vmatpush.bf16.msrb.mxu1 %v2133_v60  ;;  %2170 = vmatpush.bf16.msrb.mxu2 %v2141_v61  ;;  %v1657_v33 = vor.u32 %v2051_v25, %v1654_v26 }
  0x6e   : > { %1271 = vmatpush.bf16.msrb.mxu0 %v2124_v55  ;;  %v1737_v55 = vor.u32 %v2075_v51, %v1736_v50  ;;  %v1800_v50 = vld [vmem:[%s2508_s10 + $0x198] sm:$0xf]  ;;  %v2090_v51 = vld [vmem:[%s2508_s10 + $0x1b0] sm:$0xf0] }
  0x6f   : > { %1222 = vmatpush.bf16.msrb.mxu3 %v2116_v35 }
  0x70   : > { %2163 = vmatpush.bf16.msrb.mxu1 %v2132_v9  ;;  %2171 = vmatpush.bf16.msrb.mxu2 %v2140_v10 }
  0x71   : > { %1096 = vmatmul.bf16.gmra.mxu3 %v1701_v0  ;;  %1272 = vmatmul.bf16.vlgmr.msrb.gmra.mxu0 %v1605_v1  ;;  %v1598_v0 = vld [vmem:[%s2508_s10 + $0x24] sm:$0xf0]  ;;  %v1716_v1 = vld [vmem:[%s2508_s10 + $0xf0] sm:$0xf] }
  0x72   : > { %1135 = vmatmul.bf16.gmra.mxu1 %v1649_v2  ;;  %1313 = vmatpush.bf16.msra.mxu0 %v2139_v6  ;;  %v2069_v2 = vld [vmem:[%s2508_s10 + $0x108] sm:$0xf0]  ;;  %v2082_v6 = vld [vmem:[%s2508_s10 + $0x170] sm:$0xf0]  ;;  %v1601_v7 = vor.u32 %v2037_v63, %v1598_v0 }
  0x73   : > { %1184 = vmatmul.bf16.gmra.mxu2 %v1653_v3  ;;  %v1758_v3 = vld [vmem:[%s2508_s10 + $0x16c] sm:$0xf0]  ;;  %v1717_v8 = vor.u32 %v2069_v2, %v1716_v1  ;;  %v1765_v12 = vor.u32 %v2082_v6, %v1764_v4 }
  0x74   : > { %v1761_v11 = vor.u32 %v2078_v62, %v1758_v3 }
  0x76   : > { %1314 = vmatpush.bf16.msra.mxu0 %v2138_v24  ;;  %v2601_v24 = vld [vmem:[%s2806_s2] ss:$0 sm:$0xff] }
  0x7a   : > { %1315 = vmatpush.bf16.msra.mxu0 %v2137_v41 }
  0x7e   : > { %1316 = vmatpush.bf16.msra.mxu0 %v2136_v42 }
  0x81   : > { %1101 = vmatmul.bf16.gmra.mxu3 %v1729_v18  ;;  %1277 = vmatmul.bf16.gmra.mxu0 %v1633_v19  ;;  %v1786_v18 = vld [vmem:[%s2508_s10 + $0x1a4] sm:$0xf0]  ;;  %v1792_v19 = vld [vmem:[%s2508_s10 + $0x190] sm:$0xf] }
  0x82   : > { %1140 = vmatmul.bf16.gmra.mxu1 %v1677_v20  ;;  %1317 = vmatpush.bf16.msra.mxu0 %v2135_v56  ;;  %v2089_v20 = vld [vmem:[%s2508_s10 + $0x1a8] sm:$0xf0] }
  0x83   : > { %1189 = vmatmul.bf16.gmra.mxu2 %v1681_v21  ;;  %v1629_v21 = vor.u32 %v2044_v14, %v1626_v15  ;;  %v1606_v14 = vld [vmem:[%s2508_s10 + $0x2c] sm:$0xf0]  ;;  %v2059_v15 = vld [vmem:[%s2508_s10 + $0xbc] sm:$0xf] }
  0x84   : > { %v1693_v25 = vor.u32 %v2059_v15, %v1690_v16 }
  0x86   : > { %1318 = vmatpush.bf16.msra.mxu0 %v2134_v58  ;;  %v1685_v58 = vor.u32 %v2058_v48, %v1682_v49 }
  0x8a   : > { %1319 = vmatpush.bf16.msra.mxu0 %v2133_v60 }
  0x8e   : > { %1320 = vmatpush.bf16.msra.mxu0 %v2132_v9 }
  0x91   : > { %1106 = vmatmul.bf16.gmra.mxu3 %v1757_v36  ;;  %1282 = vmatmul.bf16.gmra.mxu0 %v1661_v37  ;;  %v1637_v36 = vor.u32 %v2045_v29, %v1634_v30  ;;  %v1641_v37 = vor.u32 %v2049_v32, %v1640_v31 }
  0x92   : > { %1145 = vmatmul.bf16.gmra.mxu1 %v1705_v38  ;;  %1362 = vmatpush.bf16.msrb.mxu0 %v2542_v5  ;;  %v1789_v5 = vor.u32 %v2085_v13, %v1786_v18  ;;  %v2038_v13 = vld [vmem:[%s2508_s10 + $0x14] sm:$0xf]  ;;  %v2063_v18 = vld [vmem:[%s2508_s10 + $0xd8] sm:$0xf0] }
  0x93   : > { %1194 = vmatmul.bf16.gmra.mxu2 %v1709_v39  ;;  %v1697_v26 = vor.u32 %v2063_v18, %v1696_v17 }
  0x96   : > { %1363 = vmatpush.bf16.msrb.mxu0 %v2553_v23  ;;  %v1793_v23 = vor.u32 %v2089_v20, %v1792_v19 }
  0x9a   : > { %1364 = vmatpush.bf16.msrb.mxu0 %v2564_v40 }
  0x9e   : > { %1365 = vmatpush.bf16.msrb.mxu0 %v2567_v43 }
  0xa1   : > { %1111 = vmatmul.bf16.gmra.mxu3 %v1785_v52  ;;  %1287 = vmatmul.bf16.gmra.mxu0 %v1689_v53  ;;  %v2052_v52 = vld [vmem:[%s2508_s10 + $0x84] sm:$0xf]  ;;  %v1662_v53 = vld [vmem:[%s2508_s10 + $0x9c] sm:$0xf0] }
  0xa2   : > { %1150 = vmatmul.bf16.gmra.mxu1 %v1733_v54  ;;  %1366 = vmatpush.bf16.msrb.mxu0 %v2143_v57  ;;  %v1668_v54 = vld [vmem:[%s2508_s10 + $0x88] sm:$0xf]  ;;  %v1665_v62 = vor.u32 %v2052_v52, %v1662_v53 }
  0xa3   : > { %1199 = vmatmul.bf16.gmra.mxu2 %v1737_v55  ;;  %v2056_v55 = vld [vmem:[%s2508_s10 + $0xa0] sm:$0xf0] }
  0xa4   : > { %v1669_v63 = vor.u32 %v2056_v55, %v1668_v54 }
  0xa6   : > { %1367 = vmatpush.bf16.msrb.mxu0 %v2142_v59  ;;  %v1801_v59 = vor.u32 %v2090_v51, %v1800_v50 }
  0xaa   : > { %1368 = vmatpush.bf16.msrb.mxu0 %v2141_v61 }
  0xae   : > { %1369 = vmatpush.bf16.msrb.mxu0 %v2140_v10 }
  0xb1   : > { %1223 = vmatmul.bf16.vlgmr.msrb.gmra.mxu3 %v1601_v7  ;;  %1292 = vmatmul.bf16.gmra.mxu0 %v1717_v8 }
  0xb2   : > { %1155 = vmatmul.bf16.gmra.mxu1 %v1761_v11  ;;  %v2065_v11 = vld [vmem:[%s2508_s10 + $0xec] sm:$0xf] }
  0xb3   : > { %1204 = vmatmul.bf16.gmra.mxu2 %v1765_v12  ;;  %v1710_v12 = vld [vmem:[%s2508_s10 + $0x104] sm:$0xf0] }
  0xc1   : > { %1228 = vmatmul.bf16.gmra.mxu3 %v1629_v21  ;;  %1297 = vmatmul.bf16.gmra.mxu0 %v1745_v22  ;;  %v1713_v21 = vor.u32 %v2065_v11, %v1710_v12  ;;  %v1609_v22 = vor.u32 %v2038_v13, %v1606_v14 }
  0xc2   : > { %1160 = vmatmul.bf16.gmra.mxu1 %v1789_v5 }
  0xc3   : > { %1209 = vmatmul.bf16.gmra.mxu2 %v1793_v23 }
  0xce   : > { %v1077_v35 = vpop.f32.mrf.mxu0 }
  0xcf   : > { %v1078_v38 = vadd.f32 %v2601_v24, %v1077_v35  ;;  %v1126_v39 = vpop.f32.mrf.mxu1  ;;  %v2072_v35 = vld [vmem:[%s2508_s10 + $0x124] sm:$0xf] }
  0xd1   : > { %v1127_v40 = vadd.f32 %v1126_v39, %v1078_v38  ;;  %1233 = vmatmul.bf16.gmra.mxu3 %v1657_v33  ;;  %1302 = vmatmul.bf16.gmra.mxu0 %v1773_v34  ;;  %v1612_v38 = vld [vmem:[%s2508_s10 + $0x18] sm:$0xf]  ;;  %v2042_v39 = vld [vmem:[%s2508_s10 + $0x30] sm:$0xf0] }
  0xd2   : > { %1326 = vmatmul.bf16.vlgmr.msrb.gmra.mxu1 %v1637_v36  ;;  %v1738_v36 = vld [vmem:[%s2508_s10 + $0x13c] sm:$0xf0] }
  0xd3   : > { %1375 = vmatmul.bf16.vlgmr.msrb.gmra.mxu2 %v1641_v37  ;;  %v2066_v37 = vld [vmem:[%s2508_s10 + $0xf4] sm:$0xf] }
  0xd4   : > { %v1087_v41 = vpop.f32.mrf.mxu3 }
  0xd5   : > { %v1088_v5 = vadd.f32 %v2601_v24, %v1087_v41  ;;  %v1724_v41 = vld [vmem:[%s2508_s10 + $0xf8] sm:$0xf] }
  0xd6   : > { %v1175_v42 = vpop.f32.mrf.mxu2  ;;  %v1079_v44 = vpop.f32.mrf.mxu0 }
  0xd7   : > { %v2612_v43 = vadd.f32 %v1175_v42, %v1127_v40  ;;  %v1080_v45 = vadd.f32 %v2601_v24, %v1079_v44  ;;  %v1128_v46 = vpop.f32.mrf.mxu1  ;;  %v1718_v40 = vld [vmem:[%s2508_s10 + $0x10c] sm:$0xf0]  ;;  %v2070_v42 = vld [vmem:[%s2508_s10 + $0x110] sm:$0xf0] }
  0xd8   : > { %v1721_v50 = vor.u32 %v2066_v37, %v1718_v40  ;;  %v1725_v51 = vor.u32 %v2070_v42, %v1724_v41 }
  0xd9   : > { %v1129_v47 = vadd.f32 %v1128_v46, %v1080_v45  ;;  %v1741_v46 = vor.u32 %v2072_v35, %v1738_v36 }
  0xdc   : > { %v1089_v56 = vpop.f32.mrf.mxu3 }
  0xdd   : > { %v1090_v31 = vadd.f32 %v2601_v24, %v1089_v56 }
  0xde   : > { %v1177_v57 = vpop.f32.mrf.mxu2  ;;  %v1082_v61 = vpop.f32.mrf.mxu0 }
  0xdf   : > { %v2623_v60 = vadd.f32 %v1177_v57, %v1129_v47  ;;  %v1083_v0 = vadd.f32 %v2601_v24, %v1082_v61  ;;  %v1131_v1 = vpop.f32.mrf.mxu1  ;;  %v1613_v47 = vor.u32 %v2042_v39, %v1612_v38  ;;  %v2079_v61 = vld [vmem:[%s2508_s10 + $0x15c] sm:$0xf] }
  0xe1   : > { %v1132_v2 = vadd.f32 %v1131_v1, %v1083_v0  ;;  %1238 = vmatmul.bf16.gmra.mxu3 %v1685_v58  ;;  %1307 = vmatmul.bf16.gmra.mxu0 %v1801_v59  ;;  %v1746_v0 = vld [vmem:[%s2508_s10 + $0x144] sm:$0xf0]  ;;  %v1752_v1 = vld [vmem:[%s2508_s10 + $0x130] sm:$0xf] }
  0xe2   : > { %1331 = vmatmul.bf16.gmra.mxu1 %v1665_v62  ;;  %v1766_v62 = vld [vmem:[%s2508_s10 + $0x174] sm:$0xf0] }
  0xe3   : > { %1380 = vmatmul.bf16.gmra.mxu2 %v1669_v63  ;;  %v2073_v63 = vld [vmem:[%s2508_s10 + $0x12c] sm:$0xf] }
  0xe4   : > { %v1092_v3 = vpop.f32.mrf.mxu3 }
  0xe5   : > { %v1093_v48 = vadd.f32 %v2601_v24, %v1092_v3 }
  0xe6   : > { %v1180_v4 = vpop.f32.mrf.mxu2  ;;  %v1084_v7 = vpop.f32.mrf.mxu0 }
  0xe7   : > { %v2626_v6 = vadd.f32 %v1180_v4, %v1132_v2  ;;  %v1085_v8 = vadd.f32 %v2601_v24, %v1084_v7  ;;  %v1133_v9 = vpop.f32.mrf.mxu1  ;;  %v2077_v2 = vld [vmem:[%s2508_s10 + $0x148] sm:$0xf0]  ;;  %v1769_v7 = vor.u32 %v2079_v61, %v1766_v62 }
  0xe9   : > { %v1134_v10 = vadd.f32 %v1133_v9, %v1085_v8  ;;  %v1749_v9 = vor.u32 %v2073_v63, %v1746_v0 }
  0xec   : > { %v1094_v19 = vpop.f32.mrf.mxu3 }
  0xed   : > { %v1095_v56 = vadd.f32 %v2601_v24, %v1094_v19 }
  0xee   : > { %v1182_v20 = vpop.f32.mrf.mxu2  ;;  %v2678_v37 = vpop.f32.mrf.mxu0 }
  0xef   : > { %v2638_v23 = vadd.f32 %v1182_v20, %v1134_v10  ;;  %v1136_v27 = vpop.f32.mrf.mxu1  ;;  %v1753_v10 = vor.u32 %v2077_v2, %v1752_v1  ;;  %v2086_v20 = vld [vmem:[%s2508_s10 + $0x194] sm:$0xf] }
  0xf0   : > { %v1137_v28 = vadd.f32 %v1136_v27, %v1088_v5  ;;  %v1774_v5 = vld [vmem:[%s2508_s10 + $0x17c] sm:$0xf0] }
  0xf1   : > { %1243 = vmatmul.bf16.gmra.mxu3 %v1713_v21  ;;  %1321 = vmatmul.bf16.vlgmr.msra.gmra.mxu0 %v1609_v22  ;;  %v1794_v21 = vld [vmem:[%s2508_s10 + $0x1ac] sm:$0xf0]  ;;  %v2080_v22 = vld [vmem:[%s2508_s10 + $0x164] sm:$0xf] }
  0xf2   : > { %1336 = vmatmul.bf16.gmra.mxu1 %v1693_v25  ;;  %v1780_v25 = vld [vmem:[%s2508_s10 + $0x168] sm:$0xf] }
  0xf3   : > { %1385 = vmatmul.bf16.gmra.mxu2 %v1697_v26  ;;  %v2084_v26 = vld [vmem:[%s2508_s10 + $0x180] sm:$0xf0] }
  0xf4   : > { %v1097_v29 = vpop.f32.mrf.mxu3 }
  0xf5   : > { %v1098_v12 = vadd.f32 %v2601_v24, %v1097_v29  ;;  %v1797_v29 = vor.u32 %v2086_v20, %v1794_v21 }
  0xf6   : > { %v1185_v30 = vpop.f32.mrf.mxu2 }
  0xf7   : > { %v2641_v32 = vadd.f32 %v1185_v30, %v1137_v28  ;;  %v1138_v33 = vpop.f32.mrf.mxu1 }
  0xf8   : > { %v1139_v34 = vadd.f32 %v1138_v33, %v1090_v31  ;;  %v1777_v33 = vor.u32 %v2080_v22, %v1774_v5 }
  0xfc   : > { %v1099_v44 = vpop.f32.mrf.mxu3 }
  0xfd   : > { %v1100_v16 = vadd.f32 %v2601_v24, %v1099_v44 }
  0xfe   : > { %v1187_v45 = vpop.f32.mrf.mxu2 }
  0xff   : > { %v2652_v49 = vadd.f32 %v1187_v45, %v1139_v34  ;;  %v1141_v52 = vpop.f32.mrf.mxu1  ;;  %v1781_v34 = vor.u32 %v2084_v26, %v1780_v25  ;;  %v2087_v45 = vld [vmem:[%s2508_s10 + $0x19c] sm:$0xf] }
 0x100   : > { %v1142_v53 = vadd.f32 %v1141_v52, %v1093_v48  ;;  %v2091_v48 = vld [vmem:[%s2508_s10 + $0x1b8] sm:$0xf0] }
 0x101   : > { %1248 = vmatmul.bf16.gmra.mxu3 %v1741_v46  ;;  %1370 = vmatmul.bf16.vlgmr.msrb.gmra.mxu0 %v1613_v47  ;;  %v1802_v46 = vld [vmem:[%s2508_s10 + $0x1b4] sm:$0xf0]  ;;  %v1808_v47 = vld [vmem:[%s2508_s10 + $0x1a0] sm:$0xf] }
 0x102   : > { %1341 = vmatmul.bf16.gmra.mxu1 %v1721_v50 }
 0x103   : > { %1390 = vmatmul.bf16.gmra.mxu2 %v1725_v51  ;;  %v2687_v51 = vpop.f32.mrf.mxu0 }
 0x104   : > { %v1102_v54 = vpop.f32.mrf.mxu3 }
 0x105   : > { %v1103_v30 = vadd.f32 %v2601_v24, %v1102_v54 }
 0x106   : > { %v1190_v55 = vpop.f32.mrf.mxu2 }
 0x107   : > { %v2655_v57 = vadd.f32 %v1190_v55, %v1142_v53  ;;  %v1143_v58 = vpop.f32.mrf.mxu1  ;;  %v1805_v55 = vor.u32 %v2087_v45, %v1802_v46 }
 0x108   : > { %v1144_v59 = vadd.f32 %v1143_v58, %v1095_v56  ;;  %v1809_v56 = vor.u32 %v2091_v48, %v1808_v47 }
 0x10b   : > { %v1278_v2 = vpop.f32.mrf.mxu0 }
 0x10c   : > { %v1104_v3 = vpop.f32.mrf.mxu3 }
 0x10d   : > { %v1105_v40 = vadd.f32 %v2601_v24, %v1104_v3 }
 0x10e   : > { %v1192_v4 = vpop.f32.mrf.mxu2 }
 0x10f   : > { %v2663_v8 = vadd.f32 %v1192_v4, %v1144_v59  ;;  %v1146_v11 = vpop.f32.mrf.mxu1 }
 0x110   : > { %v1147_v13 = vadd.f32 %v1146_v11, %v1098_v12 }
 0x111   : > { %1253 = vmatmul.bf16.gmra.mxu3 %v1769_v7 }
 0x112   : > { %1346 = vmatmul.bf16.gmra.mxu1 %v1749_v9 }
 0x113   : > { %1395 = vmatmul.bf16.gmra.mxu2 %v1753_v10 }
 0x114   : > { %v1107_v14 = vpop.f32.mrf.mxu3 }
 0x115   : > { %v1108_v53 = vadd.f32 %v2601_v24, %v1107_v14 }
 0x116   : > { %v1195_v15 = vpop.f32.mrf.mxu2 }
 0x117   : > { %v2667_v17 = vadd.f32 %v1195_v15, %v1147_v13  ;;  %v1148_v18 = vpop.f32.mrf.mxu1 }
 0x118   : > { %v1149_v19 = vadd.f32 %v1148_v18, %v1100_v16 }
 0x11c   : > { %v1109_v27 = vpop.f32.mrf.mxu3 }
 0x11d   : > { %v1110_v0 = vadd.f32 %v2601_v24, %v1109_v27 }
 0x11e   : > { %v1197_v28 = vpop.f32.mrf.mxu2 }
 0x11f   : > { %v2676_v31 = vadd.f32 %v1197_v28, %v1149_v19  ;;  %v1151_v35 = vpop.f32.mrf.mxu1 }
 0x120   : > { %v1152_v36 = vadd.f32 %v1151_v35, %v1103_v30 }
 0x121   : > { %1258 = vmatmul.bf16.gmra.mxu3 %v1797_v29 }
 0x122   : > { %1351 = vmatmul.bf16.gmra.mxu1 %v1777_v33 }
 0x123   : > { %1400 = vmatmul.bf16.gmra.mxu2 %v1781_v34 }
 0x124   : > { %v1112_v38 = vpop.f32.mrf.mxu3 }
 0x125   : > { %v1113_v11 = vadd.f32 %v2601_v24, %v1112_v38 }
 0x126   : > { %v1200_v39 = vpop.f32.mrf.mxu2 }
 0x127   : > { %v2681_v41 = vadd.f32 %v1200_v39, %v1152_v36  ;;  %v1153_v42 = vpop.f32.mrf.mxu1 }
 0x128   : > { %v1154_v44 = vadd.f32 %v1153_v42, %v1105_v40 }
 0x12c   : > { %v1114_v50 = vpop.f32.mrf.mxu3 }
 0x12d   : > { %v1115_v19 = vadd.f32 %v2601_v24, %v1114_v50 }
 0x12e   : > { %v1202_v52 = vpop.f32.mrf.mxu2 }
 0x12f   : > { %v2690_v54 = vadd.f32 %v1202_v52, %v1154_v44  ;;  %v1156_v58 = vpop.f32.mrf.mxu1 }
 0x130   : > { %v1157_v59 = vadd.f32 %v1156_v58, %v1108_v53 }
 0x132   : > { %1356 = vmatmul.bf16.gmra.mxu1 %v1805_v55 }
 0x133   : > { %1405 = vmatmul.bf16.gmra.mxu2 %v1809_v56 }
 0x134   : > { %v1224_v61 = vpop.f32.mrf.mxu3 }
 0x135   : > { %v2693_v63 = vadd.f32 %v1224_v61, %v2612_v43  ;;  %v1280_v43 = vpop.f32.mrf.mxu0 }
 0x136   : > { %v1205_v62 = vpop.f32.mrf.mxu2 }
 0x137   : > { %v2696_v1 = vadd.f32 %v1205_v62, %v1157_v59  ;;  %v1158_v3 = vpop.f32.mrf.mxu1 }
 0x138   : > { %v1159_v4 = vadd.f32 %v1158_v3, %v1110_v0 }
 0x13c   : > { %v1226_v7 = vpop.f32.mrf.mxu3 }
 0x13d   : > { %v2699_v10 = vadd.f32 %v1226_v7, %v2623_v60  ;;  %v1283_v5 = vpop.f32.mrf.mxu0 }
 0x13e   : > { %v1207_v9 = vpop.f32.mrf.mxu2 }
 0x13f   : > { %v2702_v12 = vadd.f32 %v1207_v9, %v1159_v4  ;;  %v1161_v13 = vpop.f32.mrf.mxu1 }
 0x140   : > { %v1162_v14 = vadd.f32 %v1161_v13, %v1113_v11 }
 0x144   : > { %v1229_v15 = vpop.f32.mrf.mxu3 }
 0x145   : > { %v1230_v18 = vadd.f32 %v1229_v15, %v2626_v6  ;;  %v1285_v34 = vpop.f32.mrf.mxu0 }
 0x146   : > { %v1210_v16 = vpop.f32.mrf.mxu2 }
 0x147   : > { %v2706_v20 = vadd.f32 %v1210_v16, %v1162_v14  ;;  %v1163_v21 = vpop.f32.mrf.mxu1  ;;  %v1279_v28 = vadd.f32 %v1278_v2, %v1230_v18 }
 0x148   : > { %v1164_v22 = vadd.f32 %v1163_v21, %v1115_v19 }
 0x14c   : > { %v1231_v60 = vpop.f32.mrf.mxu3 }
 0x14d   : > { %v1232_v26 = vadd.f32 %v1231_v60, %v2638_v23  ;;  %v1288_v46 = vpop.f32.mrf.mxu0 }
 0x14e   : > { %v1212_v25 = vpop.f32.mrf.mxu2 }
 0x14f   : > { %v2709_v27 = vadd.f32 %v1212_v25, %v1164_v22  ;;  %v1327_v29 = vpop.f32.mrf.mxu1  ;;  %v1281_v36 = vadd.f32 %v1280_v43, %v1232_v26 }
 0x150   : > { %v1328_v30 = vadd.f32 %v1327_v29, %v1279_v28 }
 0x154   : > { %v1234_v33 = vpop.f32.mrf.mxu3 }
 0x155   : > { %v1235_v6 = vadd.f32 %v1234_v33, %v2641_v32  ;;  %v1290_v59 = vpop.f32.mrf.mxu0 }
 0x156   : > { %v1376_v35 = vpop.f32.mrf.mxu2 }
 0x157   : > { %v2712_v24 = vadd.f32 %v1376_v35, %v1328_v30  ;;  %v1329_v38 = vpop.f32.mrf.mxu1  ;;  %v1284_v45 = vadd.f32 %v1283_v5, %v1235_v6 }
 0x158   : > { %v1330_v39 = vadd.f32 %v1329_v38, %v1281_v36 }
 0x159   : > { %vm1413_vm13 = vcmp.ge.f32.partialorder %v2712_v24, 0.0 }
 0x15c   : > { %v1236_v40 = vpop.f32.mrf.mxu3 }
 0x15d   : > { %v1237_v42 = vadd.f32 %v1236_v40, %v2652_v49  ;;  %v1293_v7 = vpop.f32.mrf.mxu0 }
 0x15e   : > { %v1378_v44 = vpop.f32.mrf.mxu2 }
 0x15f   : > { %v2715_v23 = vadd.f32 %v1378_v44, %v1330_v39  ;;  %v1332_v47 = vpop.f32.mrf.mxu1  ;;  %v1286_v55 = vadd.f32 %v1285_v34, %v1237_v42 }
 0x160   : > { %v1333_v48 = vadd.f32 %v1332_v47, %v1284_v45 }
 0x161   : > { %vm1414_vm12 = vcmp.ge.f32.partialorder %v2715_v23, 0.0 }
 0x164   : > { %v1239_v50 = vpop.f32.mrf.mxu3 }
 0x165   : > { %v1240_v52 = vadd.f32 %v1239_v50, %v2655_v57  ;;  %v1295_v18 = vpop.f32.mrf.mxu0 }
 0x166   : > { %v1381_v32 = vpop.f32.mrf.mxu2 }
 0x167   : > { %v2718_v53 = vadd.f32 %v1381_v32, %v1333_v48  ;;  %v1334_v56 = vpop.f32.mrf.mxu1  ;;  %v1289_v2 = vadd.f32 %v1288_v46, %v1240_v52 }
 0x168   : > { %v1335_v58 = vadd.f32 %v1334_v56, %v1286_v55 }
 0x169   : > { %vm1415_vm11 = vcmp.ge.f32.partialorder %v2718_v53, 0.0 }
 0x16c   : > { %v1241_v61 = vpop.f32.mrf.mxu3 }
 0x16d   : > { %v1242_v49 = vadd.f32 %v1241_v61, %v2663_v8  ;;  %v1298_v29 = vpop.f32.mrf.mxu0 }
 0x16e   : > { %v1383_v62 = vpop.f32.mrf.mxu2 }
 0x16f   : > { %v2721_v0 = vadd.f32 %v1383_v62, %v1335_v58  ;;  %v1337_v3 = vpop.f32.mrf.mxu1  ;;  %v1291_v14 = vadd.f32 %v1290_v59, %v1242_v49 }
 0x170   : > { %v1338_v4 = vadd.f32 %v1337_v3, %v1289_v2 }
 0x171   : > { %vm1416_vm10 = vcmp.ge.f32.partialorder %v2721_v0, 0.0 }
 0x174   : > { %v1244_v9 = vpop.f32.mrf.mxu3 }
 0x175   : > { %v1245_v57 = vadd.f32 %v1244_v9, %v2667_v17 }
 0x176   : > { %v1386_v11 = vpop.f32.mrf.mxu2 }
 0x177   : > { %v2724_v13 = vadd.f32 %v1386_v11, %v1338_v4  ;;  %v1339_v43 = vpop.f32.mrf.mxu1  ;;  %v1294_v22 = vadd.f32 %v1293_v7, %v1245_v57 }
 0x178   : > { %v1340_v15 = vadd.f32 %v1339_v43, %v1291_v14 }
 0x179   : > { %vm1417_vm9 = vcmp.ge.f32.partialorder %v2724_v13, 0.0 }
 0x17c   : > { %v1246_v16 = vpop.f32.mrf.mxu3 }
 0x17d   : > { %v1247_v8 = vadd.f32 %v1246_v16, %v2676_v31  ;;  %v1300_v31 = vpop.f32.mrf.mxu0 }
 0x17e   : > { %v1388_v19 = vpop.f32.mrf.mxu2 }
 0x17f   : > { %v2727_v21 = vadd.f32 %v1388_v19, %v1340_v15  ;;  %v1342_v5 = vpop.f32.mrf.mxu1  ;;  %v1296_v17 = vadd.f32 %v1295_v18, %v1247_v8 }
 0x180   : > { %v1343_v60 = vadd.f32 %v1342_v5, %v1294_v22 }
 0x181   : > { %vm1418_vm8 = vcmp.ge.f32.partialorder %v2727_v21, 0.0 }
 0x184   : > { %v1249_v25 = vpop.f32.mrf.mxu3 }
 0x185   : > { %v1303_v42 = vpop.f32.mrf.mxu0 }
 0x186   : > { %v1391_v26 = vpop.f32.mrf.mxu2 }
 0x187   : > { %v2729_v28 = vadd.f32 %v1391_v26, %v1343_v60  ;;  %v1344_v30 = vpop.f32.mrf.mxu1  ;;  %v1250_v60 = vadd.f32 %v1249_v25, %v2681_v41 }
 0x188   : > { %v1345_v33 = vadd.f32 %v1344_v30, %v1296_v17 }
 0x189   : > { %vm1419_vm7 = vcmp.ge.f32.partialorder %v2729_v28, 0.0 }
 0x18c   : > { %v1251_v34 = vpop.f32.mrf.mxu3 }
 0x18d   : > { %v1305_v47 = vpop.f32.mrf.mxu0 }
 0x18e   : > { %v1393_v6 = vpop.f32.mrf.mxu2 }
 0x18f   : > { %v2731_v35 = vadd.f32 %v1393_v6, %v1345_v33  ;;  %v1347_v36 = vpop.f32.mrf.mxu1  ;;  %v1299_v6 = vadd.f32 %v1298_v29, %v1250_v60  ;;  %v1435_v29 = vmul.f32 0.2, %v2729_v28 }
 0x191   : > { %vm1420_vm6 = vcmp.ge.f32.partialorder %v2731_v35, 0.0 }
 0x194   : > { %v1254_v38 = vpop.f32.mrf.mxu3 }
 0x195   : > { %v1308_v55 = vpop.f32.mrf.mxu0  ;;  %v1255_v14 = vadd.f32 %v1254_v38, %v2696_v1 }
 0x196   : > { %v1396_v39 = vpop.f32.mrf.mxu2 }
 0x197   : > { %v1349_v40 = vpop.f32.mrf.mxu1 }
 0x19c   : > { %v1256_v45 = vpop.f32.mrf.mxu3 }
 0x19d   : > { %v1310_v62 = vpop.f32.mrf.mxu0  ;;  %v1257_v3 = vadd.f32 %v1256_v45, %v2702_v12 }
 0x19e   : > { %v1398_v44 = vpop.f32.mrf.mxu2 }
 0x19f   : > { %v1352_v46 = vpop.f32.mrf.mxu1  ;;  %v1306_v43 = vadd.f32 %v1305_v47, %v1257_v3 }
 0x1a4   : > { %v1259_v52 = vpop.f32.mrf.mxu3 }
 0x1a5   : > { %v1260_v61 = vadd.f32 %v1259_v52, %v2706_v20  ;;  %v1252_v20 = vadd.f32 %v1251_v34, %v2690_v54  ;;  %v1348_v34 = vadd.f32 %v1347_v36, %v1299_v6  ;;  %v1322_v41 = vpop.f32.mrf.mxu0  ;;  %v1433_v52 = vmul.f32 0.2, %v2724_v13 }
 0x1a6   : > { %v1401_v48 = vpop.f32.mrf.mxu2 }
 0x1a7   : > { %v1354_v50 = vpop.f32.mrf.mxu1  ;;  %v1309_v4 = vadd.f32 %v1308_v55, %v1260_v61  ;;  %v1301_v26 = vadd.f32 %v1300_v31, %v1252_v20 }
 0x1a8   : > { %v1355_v18 = vadd.f32 %v1354_v50, %v1306_v43 }
 0x1a9   : > { %v1350_v33 = vadd.f32 %v1349_v40, %v1301_v26 }
 0x1ab   : > { %v1399_v38 = vadd.f32 %v1398_v44, %v1350_v33  ;;  %v1434_v44 = vmul.f32 0.2, %v2727_v21 }
 0x1ac   : > { %v1261_v58 = vpop.f32.mrf.mxu3 }
 0x1ad   : > { %v1262_v49 = vadd.f32 %v1261_v58, %v2709_v27  ;;  %v1304_v27 = vadd.f32 %v1303_v42, %v1255_v14  ;;  %v1397_v42 = vadd.f32 %v1396_v39, %v1348_v34  ;;  %v1438_v47 = vmul.f32 0.2, %v1399_v38  ;;  %v1324_v39 = vpop.f32.mrf.mxu0 }
 0x1ae   : > { %v1403_v32 = vpop.f32.mrf.mxu2  ;;  %vm1422_vm4 = vcmp.ge.f32.partialorder %v1399_v38, 0.0 }
 0x1af   : > { %v1357_v56 = vpop.f32.mrf.mxu1  ;;  %v1311_v7 = vadd.f32 %v1310_v62, %v1262_v49  ;;  %v1404_v19 = vadd.f32 %v1403_v32, %v1355_v18  ;;  %v1353_v12 = vadd.f32 %v1352_v46, %v1304_v27  ;;  %v1437_v25 = vmul.f32 0.2, %v1397_v42 }
 0x1b0   : > { %v1358_v9 = vadd.f32 %v1357_v56, %v1309_v4  ;;  %v1454_v31 = vsel %vm1422_vm4, %v1399_v38, %v1438_v47  ;;  %vm1421_vm5 = vcmp.ge.f32.partialorder %v1397_v42, 0.0  ;;  %v1436_v46 = vmul.f32 0.2, %v2731_v35 }
 0x1b1   : > { %v1402_v17 = vadd.f32 %v1401_v48, %v1353_v12  ;;  %v1440_v1 = vmul.f32 0.2, %v1404_v19  ;;  %vm1424_vm2 = vcmp.ge.f32.partialorder %v1404_v19, 0.0  ;;  %v1453_v40 = vsel %vm1421_vm5, %v1397_v42, %v1437_v25 }
 0x1b2   : > { %v1452_v36 = vsel %vm1420_vm6, %v2731_v35, %v1436_v46  ;;  %v1451_v48 = vsel %vm1419_vm7, %v2729_v28, %v1435_v29  ;;  %v1450_v32 = vsel %vm1418_vm8, %v2727_v21, %v1434_v44  ;;  %v1432_v35 = vmul.f32 0.2, %v2721_v0 }
 0x1b3   : > { %v1439_v45 = vmul.f32 0.2, %v1402_v17  ;;  %v1456_v54 = vsel %vm1424_vm2, %v1404_v19, %v1440_v1  ;;  %vm1423_vm3 = vcmp.ge.f32.partialorder %v1402_v17, 0.0  ;;  %v1449_v56 = vsel %vm1417_vm9, %v2724_v13, %v1433_v52 }
 0x1b4   : > { %v1431_v28 = vmul.f32 0.2, %v2718_v53  ;;  %v1448_v58 = vsel %vm1416_vm10, %v2721_v0, %v1432_v35  ;;  %v1430_v21 = vmul.f32 0.2, %v2715_v23  ;;  %v1429_v62 = vmul.f32 0.2, %v2712_v24 }
 0x1b5   : > { %v1455_v50 = vsel %vm1423_vm3, %v1402_v17, %v1439_v45  ;;  %v1371_v55 = vpop.f32.mrf.mxu0  ;;  %v1274_v0 = vadd.f32 %v2678_v37, %v2693_v63  ;;  %v1459_v63 = vld [vmem:[%s2807_s3] sm:$0x1] }
 0x1b6   : > { %v1406_v59 = vpop.f32.mrf.mxu2  ;;  %v1447_v61 = vsel %vm1415_vm11, %v2718_v53, %v1431_v28  ;;  %v1446_v3 = vsel %vm1414_vm12, %v2715_v23, %v1430_v21  ;;  %v1445_v53 = vsel %vm1413_vm13, %v2712_v24, %v1429_v62  ;;  %v1461_v23 = vstv %s1460_s6 }
 0x1b7   : > { %v1359_v2 = vpop.f32.mrf.mxu1  ;;  %v1407_v15 = vadd.f32 %v1406_v59, %v1358_v9  ;;  %v1276_v59 = vadd.f32 %v2687_v51, %v2699_v10  ;;  %v1323_v4 = vadd.f32 %v1322_v41, %v1274_v0 }
 0x1b8   : > { %v1360_v57 = vadd.f32 %v1359_v2, %v1311_v7 }
 0x1b9   : > { %v1441_v22 = vmul.f32 0.2, %v1407_v15  ;;  %vm1425_vm1 = vcmp.ge.f32.partialorder %v1407_v15, 0.0  ;;  %v1325_v13 = vadd.f32 %v1324_v39, %v1276_v59  ;;  %v1372_v51 = vadd.f32 %v1371_v55, %v1323_v4 }
 0x1bb   : > { %v1457_v30 = vsel %vm1425_vm1, %v1407_v15, %v1441_v22  ;;  %v1427_v7 = vmul.f32 0.2, %v1372_v51  ;;  %vm1411_vm15 = vcmp.ge.f32.partialorder %v1372_v51, 0.0 }
 0x1bd   : > { %v1373_v49 = vpop.f32.mrf.mxu0  ;;  %v1443_v37 = vsel %vm1411_vm15, %v1372_v51, %v1427_v7 }
 0x1be   : > { %v1408_v11 = vpop.f32.mrf.mxu2  ;;  %v1374_v2 = vadd.f32 %v1373_v49, %v1325_v13 }
 0x1bf   : > { %v1409_v16 = vadd.f32 %v1408_v11, %v1360_v57 }
 0x1c0   : > { %v1428_v10 = vmul.f32 0.2, %v1374_v2  ;;  %vm1412_vm14 = vcmp.ge.f32.partialorder %v1374_v2, 0.0 }
 0x1c1   : > { %vm1426_vm0 = vcmp.ge.f32.partialorder %v1409_v16, 0.0  ;;  %v1442_v8 = vmul.f32 0.2, %v1409_v16 }
 0x1c2   : > { %v1444_v9 = vsel %vm1412_vm14, %v1374_v2, %v1428_v10 }
 0x1c3   : > { %v1458_v5 = vsel %vm1426_vm0, %v1409_v16, %v1442_v8 }
 0x1c4   : > { %1462 = vmatpush.xpose.msra.mxu3 %v1458_v5 }
 0x1c8   : > { %1463 = vmatpush.xpose.msra.mxu3 %v1457_v30 }
 0x1cc   : > { %1464 = vmatpush.xpose.msra.mxu3 %v1456_v54 }
 0x1d0   : > { %1465 = vmatpush.xpose.msra.mxu3 %v1455_v50 }
 0x1d4   : > { %1466 = vmatpush.xpose.msra.mxu3 %v1454_v31 }
 0x1d8   : > { %1467 = vmatpush.xpose.msra.mxu3 %v1453_v40 }
 0x1dc   : > { %1468 = vmatpush.xpose.msra.mxu3 %v1452_v36 }
 0x1e0   : > { %1469 = vmatpush.xpose.msra.mxu3 %v1451_v48 }
 0x1e4   : > { %1470 = vmatpush.xpose.msra.mxu3 %v1450_v32 }
 0x1e8   : > { %1471 = vmatpush.xpose.msra.mxu3 %v1449_v56 }
 0x1ec   : > { %1472 = vmatpush.xpose.msra.mxu3 %v1448_v58 }
 0x1f0   : > { %1473 = vmatpush.xpose.msra.mxu3 %v1447_v61 }
 0x1f4   : > { %1474 = vmatpush.xpose.msra.mxu3 %v1446_v3 }
 0x1f8   : > { %1475 = vmatpush.xpose.msra.mxu3 %v1445_v53 }
 0x1fc   : > { %1476 = vmatpush.xpose.msra.mxu3 %v1444_v9 }
 0x200   : > { %1477 = vmatpush.xpose.msra.mxu3 %v1443_v37 }
 0x203   : > { %1478 = vmatmul.f32.vlgmr.msra.gmra.mxu3 %v1459_v63 }
 0x286   : > { %v1479_v57 = vpop.f32.mrf.mxu3 }
 0x287   : > { %v1480_v24 = vadd.f32 %v1479_v57, %v1461_v23 }
 0x289   : > { %v1482_v11 = vsub.f32 0.0, %v1480_v24 }
 0x28b   : > { %v1483_v14 = vmul.f32 1.442695, %v1482_v11 }
 0x28d   : > { %2237 = vpow2.f32 %v1483_v14 }
 0x293   : > { %v2238_v43 = vpop.eup %2237 }
 0x294   : > { %v1485_v15 = vadd.f32 1.0, %v2238_v43 }
 0x296   : > { %2239 = vrcp.f32 %v1485_v15 }
 0x29c   : > { %v2240_v16 = vpop.eup %2239 }
 0x29d   : > { %1487 = vst [vmem:[%s262_s16] sm:$0x1] %v2240_v16 }
 0x29e   : > { %2328 = shalt.err (!%p2325_p10)
}
 0x29f   : > { %2181 = dma.vmem_to_hbm [thread:$0]  (%p2478_p7), %s1500_s18, 16, %s1502_s19, %s1489_s15  }
 0x2a0 PF: > { %s1513_s24 = sand.u32 1, %s2359_s20   ;;  %p2815_p12 = scmp.ge.s32.totalorder %s2371_s23, 2 }
 0x2a1   : > { %s1514_s27 = scalar_lea.sflag [#allocation5], %s1513_s24 }
 0x2a2   : > { %p2192_p13 = pnand %p2815_p12, %p2446_p6 }
 0x2a4   : > { %p2193_p0 = pneg %p2192_p13 }
 0x2a6   : > { %2354 = dma.done.wait (%p2193_p0), %s1514_s27, 16  }
 0x2a7   : > { %2356 = vsyncadd (%p2193_p0), %s1514_s27, 4294967280  ;;  %p20_p3 = scmp.ge.s32.totalorder %s2464_s8, 4   ;;  %s2816_s20 = smov %s2363_s21 }
 0x2a8   : > { %s2817_s21 = smov %s2367_s22  ;;  %s2818_s22 = smov %s2474_s13 }
 0x2a9   : > { %s2819_s23 = smov %s2464_s8  ;;  %22 = sbr.rel (!%p20_p3) target bundleno = 8 (0x8), region = 89 }
 0x2ae   :  { %1519 = vsyncpa [#allocation4], 1 }
 0x2af   :  { %1521 = vsyncpa [#allocation4 + $0x1], 1 }
 0x2b0   :  { %1522 = vsyncpa [#allocation7], 1 }
 0x2b1   :  { %1523 = vsyncpa [#allocation5], 1 }
 0x2b2   :  { %1525 = vsyncpa [#allocation5 + $0x1], 1 }

</bundles_post_ra>
